<compile_context>
chip_gen: v7x
topology: tpu7x:2x2x1
jax: 0.10.0
libtpu: 0.0.40
codegen_flags: <defaults>
</compile_context>

<pallas_src>
import jax
import jax.numpy as jnp
from jax import lax
from jax.experimental import pallas as pl
from jax.experimental.pallas import tpu as pltpu


def _round_up(x, m):
    return (x + m - 1) // m * m


def _chip_defaults():
    """(target_block_bytes, vmem_limit_bytes) per TPU generation."""
    try:
        cap = getattr(pltpu.get_tpu_info(), "vmem_capacity_bytes", None)
    except Exception:  # pragma: no cover - info unavailable
        cap = None
    if cap is None or cap <= 64 * 1024 * 1024:
        # v7x-class (64 MiB VMEM / TC) or unknown: stay conservative.
        return 4 * 1024 * 1024, 44 * 1024 * 1024
    # v5e / v6e: 128 MiB physical VMEM; raise the 32 MiB scoped default.
    return 8 * 1024 * 1024, 96 * 1024 * 1024


def _make_kernel(br, tb, hw, out_cols, ragged):
    n_fold = hw // out_cols  # 1 => no in-kernel lane fold

    def kernel(pos_ref, rows_ref, cols_ref, mp_ref, out_ref):
        # Box corners for the TB rows of this block, each (TB, 1) int32.
        posv = pos_ref[...]
        r0 = posv[:, 0:1]
        c0 = posv[:, 1:2]
        r1 = posv[:, 2:3]
        c1 = posv[:, 3:4]

        # Clamped inclusive spans (per-row, cheap).  max(.,0) keeps inverted
        # boxes (r1 < r0) empty, matching torch's empty-slice behaviour.
        rspan = pltpu.bitcast(jnp.maximum(r1 - r0 + 1, 0), jnp.uint32)
        cspan = pltpu.bitcast(jnp.maximum(c1 - c0 + 1, 0), jnp.uint32)

        rows = rows_ref[...]                      # (1, H*W) int32 : idx // W
        cols = cols_ref[...]                      # (1, H*W) int32 : idx %  W
        # Unsigned range test: 0 <= idx - lo < span  (sub + cmp per axis).
        in_r = pltpu.bitcast(rows - r0, jnp.uint32) < rspan
        in_c = pltpu.bitcast(cols - c0, jnp.uint32) < cspan
        gt = in_r & in_c                          # (TB, H*W) bool

        # Cast to f32 in-kernel (HBM stream stays in the source dtype).
        p = mp_ref[...].astype(jnp.float32)
        # Single log per element via where-select.
        q = jnp.where(gt, p, 1.0 - p)
        logq = jnp.log(q)

        if ragged:
            # Zero rows past the end of the (unpadded) array: the last block
            # reads garbage there; the select discards it before the sum.
            i = pl.program_id(0)
            row_id = i * tb + lax.broadcasted_iota(jnp.int32, (tb, 1), 0)
            logq = jnp.where(row_id < br, logq, 0.0)

        # Sublane reduce to a lane-dense (1, H*W) partial ...
        partial = jnp.sum(logq, axis=0, keepdims=True)
        # ... then fold lane-aligned 128-wide chunks so only (1, 128) goes
        # back to HBM (static, 128-aligned slices of a value: no relayout).
        if n_fold > 1:
            acc = partial[:, 0:out_cols]
            for j in range(1, n_fold):
                acc = acc + partial[:, j * out_cols:(j + 1) * out_cols]
            partial = acc
        out_ref[...] = partial.reshape(out_ref.shape)

    return kernel


def crop_cross_entropy(mask_pred, pos_gt, *, target_block_bytes=None,
                       vmem_limit_bytes=None):
    b, r, h, w = mask_pred.shape
    br = b * r
    hw = h * w

    default_block, default_vmem = _chip_defaults()
    if target_block_bytes is None:
        target_block_bytes = default_block
    if vmem_limit_bytes is None:
        vmem_limit_bytes = default_vmem

    # Keep the source dtype for the HBM->VMEM DMA; cast to f32 inside the
    # kernel (so bf16 / fp8 inputs stream at their native width).
    mp = mask_pred.reshape(br, hw)
    pos = pos_gt.reshape(br, 4).astype(jnp.int32)

    itemsize = jnp.dtype(mp.dtype).itemsize
    mult = max(8, 32 // itemsize)                 # packed sublane tile height

    # Block height TB: ~target_block_bytes per input block, sublane-aligned.
    tb = (target_block_bytes // (hw * itemsize)) // mult * mult
    tb = max(mult, tb)
    # VMEM budget: 2x double-buffered input + ~5 f32 elementwise temps.
    budget = max(vmem_limit_bytes - (2 << 20), 4 << 20)
    per_row_bytes = hw * (2 * itemsize + 20)
    tb_vmem = max(mult, (budget // per_row_bytes) // mult * mult)
    tb = min(tb, tb_vmem)
    # Don't exceed the row count; keep >= 2 blocks so the "parallel" grid axis
    # can shard across both v7x TensorCores.
    tb = min(tb, _round_up(br, mult))
    tb = min(tb, _round_up(pl.cdiv(br, 2), mult))

    num_blocks = pl.cdiv(br, tb)
    ragged = (br % tb) != 0

    # Flat-index -> (row, col) lookup vectors shared by every block (avoids
    # per-element integer div/mod inside the kernel).
    flat = jnp.arange(hw, dtype=jnp.int32)
    row_idx = (flat // w).reshape(1, hw)
    col_idx = (flat % w).reshape(1, hw)

    # In-kernel cross-lane fold target (128 lanes) when cheap to unroll.
    if hw % 128 == 0 and hw // 128 <= 16:
        out_cols = 128
    else:
        out_cols = hw

    partials = pl.pallas_call(
        _make_kernel(br, tb, hw, out_cols, ragged),
        out_shape=jax.ShapeDtypeStruct((num_blocks, 1, out_cols), jnp.float32),
        grid=(num_blocks,),
        in_specs=[
            pl.BlockSpec((tb, 4), lambda i: (i, 0)),
            pl.BlockSpec((1, hw), lambda i: (0, 0)),
            pl.BlockSpec((1, hw), lambda i: (0, 0)),
            pl.BlockSpec((tb, hw), lambda i: (i, 0)),
        ],
        out_specs=pl.BlockSpec((1, 1, out_cols), lambda i: (i, 0, 0)),
        compiler_params=pltpu.CompilerParams(
            dimension_semantics=("parallel",),
            vmem_limit_bytes=vmem_limit_bytes),
    )(pos, row_idx, col_idx, mp)

    # Negate hoisted out of the kernel: partials hold sum(log(q)) <= 0.
    return -jnp.sum(partials) / (br * h * w)


def _reference(mask_pred, pos_gt):
    b, r, h, w = mask_pred.shape
    mp = mask_pred.reshape(b * r, h, w).astype(jnp.float32)
    pos = pos_gt.reshape(b * r, 4)
    rows = jnp.arange(h)[None, :, None]
    cols = jnp.arange(w)[None, None, :]
    gt = ((rows >= pos[:, 0, None, None]) & (rows <= pos[:, 2, None, None]) &
          (cols >= pos[:, 1, None, None]) & (cols <= pos[:, 3, None, None])
          ).astype(jnp.float32)
    return -(jnp.log(mp) * gt + jnp.log(1.0 - mp) * (1.0 - gt)).mean()


def _make_inputs(key, B, R, H, W):
    k1, k2 = jax.random.split(key)
    # predictions strictly inside (0, 1) so log / log(1-p) are finite
    mask_pred = jax.nn.sigmoid(jax.random.normal(k1, (B, R, H, W), jnp.float32))
    # boxes: [row0, col0, row1, col1] inclusive, row0<=row1, col0<=col1
    c = jax.random.randint(k2, (B, R, 4), 0, H)
    row0 = jnp.minimum(c[..., 0], c[..., 2])
    row1 = jnp.maximum(c[..., 0], c[..., 2])
    col0 = jnp.minimum(c[..., 1], c[..., 3])
    col1 = jnp.maximum(c[..., 1], c[..., 3])
    pos_gt = jnp.stack([row0, col0, row1, col1], axis=-1).astype(jnp.int32)
    return mask_pred, pos_gt


if __name__ == "__main__":
    key = jax.random.PRNGKey(0)
    ka, kb = jax.random.split(key)

    # Main small test (single block, lane-fold path).
    mask_pred, pos_gt = _make_inputs(ka, 2, 4, 16, 16)
    out = crop_cross_entropy(mask_pred, pos_gt)
    jax.block_until_ready(out)
    ref = _reference(mask_pred, pos_gt)
    assert jnp.allclose(out, ref, rtol=1e-5, atol=1e-5), (out, ref)

    # Multi-block + ragged tail: br = 15 with tb = 8 -> 2 blocks, last partial,
    # exercising the no-padding / in-kernel row mask path.
    mask_pred2, pos_gt2 = _make_inputs(kb, 3, 5, 16, 16)
    out2 = crop_cross_entropy(mask_pred2, pos_gt2, target_block_bytes=8 * 1024)
    jax.block_until_ready(out2)
    ref2 = _reference(mask_pred2, pos_gt2)
    assert jnp.allclose(out2, ref2, rtol=1e-5, atol=1e-5), (out2, ref2)

    print("KERNEL_OK")
</pallas_src>

<mosaic_0001>
module attributes {stable_mosaic.version = 11 : i64} {
  func.func @kernel(%arg0: i32, %arg1: memref<8x4xi32, #tpu.memory_space<vmem>>, %arg2: memref<1x256xi32, #tpu.memory_space<vmem>>, %arg3: memref<1x256xi32, #tpu.memory_space<vmem>>, %arg4: memref<8x256xf32, #tpu.memory_space<vmem>>, %arg5: memref<1x1x128xf32, #tpu.memory_space<vmem>>) attributes {dimension_semantics = [#tpu.dimension_semantics<parallel>], iteration_bounds = array<i64: 1>, scalar_prefetch = 0 : i64, scratch_operands = 0 : i64, tpu.core_type = #tpu.core_type<tc>, window_params = [{transform_indices = @transform_0, window_bounds = array<i64: 8, 4>}, {pipeline_mode = #tpu.pipeline_mode<synchronous>, transform_indices = @transform_1, window_bounds = array<i64: 1, 256>}, {pipeline_mode = #tpu.pipeline_mode<synchronous>, transform_indices = @transform_2, window_bounds = array<i64: 1, 256>}, {transform_indices = @transform_3, window_bounds = array<i64: 8, 256>}, {transform_indices = @transform_4, window_bounds = array<i64: 1, 1, 128>}]} {
    %c0 = arith.constant 0 : index
    %c0_0 = arith.constant 0 : index
    %0 = vector.load %arg1[%c0, %c0_0] : memref<8x4xi32, #tpu.memory_space<vmem>>, vector<8x4xi32>
    %1 = vector.extract_strided_slice %0 {offsets = [0, 0], sizes = [8, 1], strides = [1, 1]} : vector<8x4xi32> to vector<8x1xi32>
    %2 = vector.extract_strided_slice %0 {offsets = [0, 1], sizes = [8, 1], strides = [1, 1]} : vector<8x4xi32> to vector<8x1xi32>
    %3 = vector.extract_strided_slice %0 {offsets = [0, 2], sizes = [8, 1], strides = [1, 1]} : vector<8x4xi32> to vector<8x1xi32>
    %4 = vector.extract_strided_slice %0 {offsets = [0, 3], sizes = [8, 1], strides = [1, 1]} : vector<8x4xi32> to vector<8x1xi32>
    %5 = arith.subi %3, %1 : vector<8x1xi32>
    %c1_i32 = arith.constant 1 : i32
    %6 = vector.broadcast %c1_i32 : i32 to vector<8x1xi32>
    %7 = arith.addi %5, %6 : vector<8x1xi32>
    %c0_i32 = arith.constant 0 : i32
    %8 = vector.broadcast %c0_i32 : i32 to vector<8x1xi32>
    %9 = arith.maxsi %7, %8 : vector<8x1xi32>
    %10 = tpu.bitcast %9 : vector<8x1xi32> -> vector<8x1xi32>
    %11 = arith.subi %4, %2 : vector<8x1xi32>
    %c1_i32_1 = arith.constant 1 : i32
    %12 = vector.broadcast %c1_i32_1 : i32 to vector<8x1xi32>
    %13 = arith.addi %11, %12 : vector<8x1xi32>
    %c0_i32_2 = arith.constant 0 : i32
    %14 = vector.broadcast %c0_i32_2 : i32 to vector<8x1xi32>
    %15 = arith.maxsi %13, %14 : vector<8x1xi32>
    %16 = tpu.bitcast %15 : vector<8x1xi32> -> vector<8x1xi32>
    %c0_3 = arith.constant 0 : index
    %c0_4 = arith.constant 0 : index
    %17 = vector.load %arg2[%c0_3, %c0_4] : memref<1x256xi32, #tpu.memory_space<vmem>>, vector<1x256xi32>
    %c0_5 = arith.constant 0 : index
    %c0_6 = arith.constant 0 : index
    %18 = vector.load %arg3[%c0_5, %c0_6] : memref<1x256xi32, #tpu.memory_space<vmem>>, vector<1x256xi32>
    %19 = vector.broadcast %17 : vector<1x256xi32> to vector<8x256xi32>
    %20 = vector.broadcast %1 : vector<8x1xi32> to vector<8x256xi32>
    %21 = arith.subi %19, %20 : vector<8x256xi32>
    %22 = tpu.bitcast %21 : vector<8x256xi32> -> vector<8x256xi32>
    %23 = vector.broadcast %10 : vector<8x1xi32> to vector<8x256xi32>
    %24 = arith.cmpi ult, %22, %23 : vector<8x256xi32>
    %25 = vector.broadcast %18 : vector<1x256xi32> to vector<8x256xi32>
    %26 = vector.broadcast %2 : vector<8x1xi32> to vector<8x256xi32>
    %27 = arith.subi %25, %26 : vector<8x256xi32>
    %28 = tpu.bitcast %27 : vector<8x256xi32> -> vector<8x256xi32>
    %29 = vector.broadcast %16 : vector<8x1xi32> to vector<8x256xi32>
    %30 = arith.cmpi ult, %28, %29 : vector<8x256xi32>
    %31 = arith.andi %24, %30 : vector<8x256xi1>
    %c0_7 = arith.constant 0 : index
    %c0_8 = arith.constant 0 : index
    %32 = vector.load %arg4[%c0_7, %c0_8] : memref<8x256xf32, #tpu.memory_space<vmem>>, vector<8x256xf32>
    %cst = arith.constant 1.000000e+00 : f32
    %33 = vector.broadcast %cst : f32 to vector<8x256xf32>
    %34 = arith.subf %33, %32 : vector<8x256xf32>
    %35 = arith.select %31, %32, %34 : vector<8x256xi1>, vector<8x256xf32>
    %36 = math.log %35 : vector<8x256xf32>
    %cst_9 = arith.constant dense<0.000000e+00> : vector<256xf32>
    %37 = vector.multi_reduction <add>, %36, %cst_9 [0] : vector<8x256xf32> to vector<256xf32>
    %38 = vector.shape_cast %37 : vector<256xf32> to vector<1x256xf32>
    %39 = vector.extract_strided_slice %38 {offsets = [0, 0], sizes = [1, 128], strides = [1, 1]} : vector<1x256xf32> to vector<1x128xf32>
    %40 = vector.extract_strided_slice %38 {offsets = [0, 128], sizes = [1, 128], strides = [1, 1]} : vector<1x256xf32> to vector<1x128xf32>
    %41 = arith.addf %39, %40 : vector<1x128xf32>
    %42 = vector.shape_cast %41 : vector<1x128xf32> to vector<1x1x128xf32>
    %c0_10 = arith.constant 0 : index
    %c0_11 = arith.constant 0 : index
    %c0_12 = arith.constant 0 : index
    %43 = vector.load %arg5[%c0_10, %c0_11, %c0_12] : memref<1x1x128xf32, #tpu.memory_space<vmem>>, vector<1x1x128xf32>
    tpu.vector_store %arg5[%c0_10, %c0_11, %c0_12], %42 {strides = array<i32>} : memref<1x1x128xf32, #tpu.memory_space<vmem>>, vector<1x1x128xf32>,
    return
  }
  func.func @transform_0(%arg0: i32) -> (i32, i32) {
    %c0_i32 = arith.constant 0 : i32
    %c0_i32_0 = arith.constant 0 : i32
    return %arg0, %c0_i32 : i32, i32
  }
  func.func @transform_1(%arg0: i32) -> (i32, i32) {
    %c0_i32 = arith.constant 0 : i32
    %c0_i32_0 = arith.constant 0 : i32
    %c0_i32_1 = arith.constant 0 : i32
    return %c0_i32, %c0_i32_0 : i32, i32
  }
  func.func @transform_2(%arg0: i32) -> (i32, i32) {
    %c0_i32 = arith.constant 0 : i32
    %c0_i32_0 = arith.constant 0 : i32
    %c0_i32_1 = arith.constant 0 : i32
    return %c0_i32, %c0_i32_0 : i32, i32
  }
  func.func @transform_3(%arg0: i32) -> (i32, i32) {
    %c0_i32 = arith.constant 0 : i32
    %c0_i32_0 = arith.constant 0 : i32
    return %arg0, %c0_i32 : i32, i32
  }
  func.func @transform_4(%arg0: i32) -> (i32, i32, i32) {
    %c0_i32 = arith.constant 0 : i32
    %c0_i32_0 = arith.constant 0 : i32
    %c0_i32_1 = arith.constant 0 : i32
    return %arg0, %c0_i32, %c0_i32_0 : i32, i32, i32
  }
}

</mosaic_0001>

<bundles_post_ra>
// kernel: tpu_custom_call.1
= control target key start
LH: loop header
LB: loop body
LE: loop exit
PB: predicated region body
PF: predicated region fallthrough
CT: control target
= control target key end

     0   :  { %s142_s17 = smov 2   ;;  %v143_v1 = vmov 1   ;;  %s200_s0 = inlined_call_operand.vmem [shape: s32[8,4], index: 0, kind: input, shape index: {}]   ;;  %s201_s1 = inlined_call_operand.vmem [shape: s32[1,256], index: 1, kind: input, shape index: {}]   ;;  %s202_s2 = inlined_call_operand.vmem [shape: s32[1,256], index: 2, kind: input, shape index: {}]   ;;  %s203_s3 = inlined_call_operand.vmem [shape: f32[8,256], index: 3, kind: input, shape index: {}]   ;;  %s204_s4 = inlined_call_operand.hbm [shape: f32[1,1,128], index: 4, kind: output, shape index: {}]  }
   0x1   :  { %v18_v0 = vld [vmem:[%s200_s0] sm:$0xff]  ;;  %110 = vset.pattern.permute.xlu1 %v143_v1 }
   0x2   :  { %19 = vrot.lane.b32.xlu0 %v18_v0, %s142_s17 }
   0x3   :  { %9 = vsyncpa [#allocation3], 0  ;;  %54 = vperm.xlu1 %110, %v18_v0   ;;  %v144_v2 = vmov 0   ;;  %v145_v3 = vmov 2   ;;  %v146_v4 = vmov 3   ;;  %v27_v9 = vlaneseq  ;;  %v65_v22 = vld [vmem:[%s203_s3] sm:$0xff] }
   0x4   :  { %109 = vset.pattern.permute.xlu0 %v144_v2  ;;  %v25_v12 = vld [vmem:[%s201_s1] sm:$0x3]  ;;  %v66_v24 = vld [vmem:[%s203_s3 + $0x8] sm:$0xff]  ;;  %v67_v28 = vsub.f32 1.0, %v65_v22  ;;  %s147_s1 = smov [#allocation2]  }
   0x5   :  { %v28_v10 = vshrl.u32 %v27_v9, 7  ;;  %v26_v15 = vld [vmem:[%s202_s2] sm:$0x3]  ;;  %v68_v29 = vsub.f32 1.0, %v66_v24  ;;  %s95_s2 = sshll.u32 %s147_s1, 4  ;;  %s96_s2 = int_to_ptr.vmem [resolvable:$true] %s95_s2 }
   0x6   :  { %36 = vperm.xlu0 %109, %v18_v0   ;;  %s118_s3 = scalar_lea.vmem %s96_s2, 16  ;;  %s122_s25 = scalar_lea.vmem %s96_s2, 32 }
   0x7   :  { %111 = vset.pattern.permute.xlu1 %v145_v3  ;;  %v29_v13 = vsub.s32 0, %v28_v10  ;;  %v33_v14 = vsub.s32 1, %v28_v10  ;;  %p119_p0 = scmp.ne.s32.totalorder %s96_s2, %s118_s3  ;;  %p123_p1 = scmp.lt.s32.totalorder %s96_s2, %s96_s2 }
   0x8   :  { %p124_p2 = scmp.lt.s32.totalorder %s122_s25, %s118_s3 }
   0x9   :  { %v30_v16 = vrot.slane %v25_v12, %v29_v13  ;;  %v34_v17 = vrot.slane %v25_v12, %v33_v14  ;;  %v48_v19 = vrot.slane %v26_v15, %v29_v13  ;;  %v52_v20 = vrot.slane %v26_v15, %v33_v14 }
   0xa   :  { %113 = vset.pattern.permute.xlu0 %v146_v4  ;;  %p125_p3 = por %p124_p2, %p123_p1 }
   0xc   :  { %p126_p4 = pnand %p125_p3, %p119_p0 }
  0x74   :  { %v20_v5 = vpop.permute.xlu0 %19 }
  0x75   :  { %v21_v6 = vsub.s32 %v18_v0, %v20_v5 }
  0x77   :  { %v22_v7 = vadd.s32 1, %v21_v6 }
  0x79   :  { %vm23_vm0 = vcmp.gt.s32.totalorder %v22_v7, 0 }
  0x7a   :  { %v24_v8 = vsel %vm23_vm0, %v22_v7, 0 }
  0x7b   :  { %41 = vperm.xlu1 %111, %v24_v8  }
  0x7f   :  { %112 = vset.pattern.permute.xlu1 %v146_v4 }
  0x80   :  { %59 = vperm.xlu1 %112, %v24_v8  }
  0x82   :  { %v55_v11 = vpop.permute.xlu1 %54 }
  0x83   :  { %v56_v26 = vsub.s32 %v48_v19, %v55_v11  ;;  %v57_v27 = vsub.s32 %v52_v20, %v55_v11 }
  0x85   :  { %v37_v18 = vpop.permute.xlu0 %36 }
  0x86   :  { %v38_v23 = vsub.s32 %v30_v16, %v37_v18  ;;  %v39_v25 = vsub.s32 %v34_v17, %v37_v18 }
  0xfa   :  { %v42_v21 = vpop.permute.xlu1 %41 }
  0xfb   :  { %vm43_vm1 = vcmp.lt.u32.totalorder %v38_v23, %v42_v21  ;;  %vm44_vm4 = vcmp.lt.u32.totalorder %v39_v25, %v42_v21 }
  0xff   :  { %v60_v30 = vpop.permute.xlu1 %59 }
 0x100   :  { %vm61_vm2 = vcmp.lt.u32.totalorder %v56_v26, %v60_v30  ;;  %vm62_vm3 = vcmp.lt.u32.totalorder %v57_v27, %v60_v30 }
 0x101   :  { %vm63_vm5 = vmand %vm43_vm1, %vm61_vm2 }
 0x102   :  { %vm64_vm6 = vmand %vm44_vm4, %vm62_vm3  ;;  %v69_v31 = vsel %vm63_vm5, %v65_v22, %v67_v28 }
 0x103   :  { %v70_v32 = vsel %vm64_vm6, %v66_v24, %v68_v29  ;;  %114 = vlog2.f32 %v69_v31 }
 0x104   :  { %116 = vlog2.f32 %v70_v32 }
 0x10d   :  { %v115_v33 = vpop.eup %114 }
 0x10e   :  { %v117_v34 = vpop.eup %116  ;;  %v72_v35 = vmul.f32 0.6931472, %v115_v33 }
 0x10f   :  { %v74_v36 = vmul.f32 0.6931472, %v117_v34 }
 0x110   :  { %v75_v37 = vrot.slane %v72_v35, 4 }
 0x111   :  { %v81_v38 = vrot.slane %v74_v36, 4 }
 0x112   :  { %v76_v39 = vadd.f32 %v75_v37, %v72_v35 }
 0x113   :  { %v82_v40 = vadd.f32 %v81_v38, %v74_v36 }
 0x114   :  { %v77_v41 = vrot.slane %v76_v39, 2 }
 0x115   :  { %v83_v42 = vrot.slane %v82_v40, 2 }
 0x116   :  { %v78_v43 = vadd.f32 %v77_v41, %v76_v39 }
 0x117   :  { %v84_v44 = vadd.f32 %v83_v42, %v82_v40 }
 0x118   :  { %v79_v45 = vrot.slane %v78_v43, 1 }
 0x119   :  { %v85_v46 = vrot.slane %v84_v44, 1 }
 0x11a   :  { %v80_v47 = vadd.f32 %v79_v45, %v78_v43 }
 0x11b   :  { %v86_v48 = vadd.f32 %v85_v46, %v84_v44 }
 0x11d   :  { %v87_v49 = vadd.f32 %v86_v48, %v80_v47 }
 0x11f   :  { %88 = vst [vmem:[#allocation2] sm:$0x1] %v87_v49 }
 0x120   :  { %129 = shalt.err (!%p126_p4)
}
 0x121   :  { %s130_s28 = scalar_lea.hbm %s204_s4, 16 }
 0x122   :  { %p131_p5 = scmp.ne.s32.totalorder %s204_s4, %s130_s28  ;;  %p134_p6 = scmp.lt.u32.totalorder %s130_s28, %s204_s4 }
 0x124   :  { %p136_p7 = pnand %p134_p6, %p131_p5 }
 0x126   :  { %139 = shalt.err (!%p136_p7)
}
 0x127   :  { %98 = dma.vmem_to_hbm [thread:$0]  %s96_s2, 16, %s204_s4, [#allocation3]  }
 0x128   :  { %140 = dma.done.wait [#allocation3], 16  }
 0x129   :  { %141 = vsyncadd [#allocation3], 4294967280 }
 0x12a   :  { %102 = vsyncpa [#allocation3], 1 }

</bundles_post_ra>
